<compile_context>
chip_gen: v7x
topology: tpu7x:2x2x1
jax: 0.10.0
libtpu: 0.0.40
codegen_flags: <defaults>
</compile_context>

<pallas_src>
import functools

import numpy as np
import jax
import jax.numpy as jnp
from jax.experimental import pallas as pl
from jax.experimental.pallas import tpu as pltpu

LEVEL = 3  # J
B3_WEIGHTS = np.array([1 / 16, 1 / 4, 3 / 8, 1 / 4, 1 / 16], dtype=np.float64)


def _reflect_conv_matrix(length: int, dilation: int) -> np.ndarray:
    """A[n, m] s.t. (A @ x)[n] == Conv1d(k=5, dilation=d, padding=2d, reflect, B3 weights)(x)[n]."""
    pad = 2 * dilation
    assert pad < length, "reflect padding must be smaller than the axis length"
    mat = np.zeros((length, length), dtype=np.float64)
    for n in range(length):
        for k in range(5):
            m = n + (k - 2) * dilation
            if m < 0:
                m = -m
            elif m >= length:
                m = 2 * length - 2 - m
            mat[n, m] += B3_WEIGHTS[k]
    return mat


def _pick_batch_tile(batch: int, height: int, max_lanes: int = 512) -> int:
    """Largest batch tile whose packed lane width (tile*height) is legal and bounded.

    Legality: block lane dim must be a multiple of 128 or equal to the full array dim.
    Bound: keeps the block-diagonal H operator ((tile*H)^2 f32) and its FLOP inflation small.
    Preference: >=2 grid steps (keeps both v7x TensorCores busy) while staying lane-dense.
    """
    valid = [d for d in range(1, batch + 1)
             if batch % d == 0 and ((d * height) % 128 == 0 or d == batch)]
    capped = [d for d in valid if d * height <= max_lanes] or [min(valid)]
    multi = [d for d in capped if batch // d >= 2 and (d * height) % 128 == 0]
    return max(multi or capped)


def _uwt_kernel(x_ref, aw_ref, aht_ref, out_ref, *, level: int):
    """Per-batch-tile kernel (everything lane-dense, pure 2-D MXU matmuls).

    x_ref   : (W, BT*H)            transposed images packed along lanes (col = b*H + h)
    aw_ref  : (J, W, W)            cumulative W-axis reflect-conv operators  L^W_j
    aht_ref : (J, BT*H, BT*H)      block-diag (over batch tile) of (L^H_j)^T
    out_ref : (J+1, W, BT*H)       [w_1, ..., w_J, c_J] in the packed transposed layout
    """
    x0 = x_ref[...]
    c_prev = x0
    for j in range(level):  # static unroll; each level depends only on x0 -> independent MXU chains
        t = jnp.dot(aw_ref[j], x0, preferred_element_type=jnp.float32)   # W-axis conv
        c = jnp.dot(t, aht_ref[j], preferred_element_type=jnp.float32)   # H-axis conv (block-diag)
        out_ref[j] = c_prev - c
        c_prev = c
    out_ref[level] = c_prev


def b3spline_uwt_approx1(x: jax.Array, level: int = LEVEL) -> jax.Array:
    """JAX/Pallas equivalent of B3SplineUWTApprox1(level, dim=2, return_all=True).forward."""
    batch, height, width = x.shape
    b_tile = _pick_batch_tile(batch, height)
    num_tiles = batch // b_tile
    bth = b_tile * height

    # Host-side cumulative operators (float64 products, cast once to f32).
    cur_h, cur_w = np.eye(height), np.eye(width)
    lh, lw = [], []
    for j in range(level):
        cur_h = _reflect_conv_matrix(height, 2 ** j) @ cur_h
        cur_w = _reflect_conv_matrix(width, 2 ** j) @ cur_w
        lh.append(cur_h)
        lw.append(cur_w)
    aw_cum = jnp.asarray(np.stack(lw).astype(np.float32))                      # (J, W, W)
    eye_b = np.eye(b_tile)
    ah_cum_bdt = jnp.asarray(
        np.stack([np.kron(eye_b, m.T) for m in lh]).astype(np.float32))        # (J, BT*H, BT*H)

    # Lane-packed transposed input: xt[w, b*H + h] = x[b, h, w]   (layout plumbing, XLA side)
    xt = jnp.transpose(x.astype(jnp.float32), (2, 0, 1)).reshape(width, batch * height)

    # VMEM budget: x/out blocks double-buffered, operator stacks single-buffered.
    block_bytes = 4 * (2 * width * bth + 2 * (level + 1) * width * bth
                       + level * width * width + level * bth * bth)
    try:
        vmem_cap = int(pltpu.get_tpu_info().vmem_capacity_bytes)
    except Exception:
        vmem_cap = 64 * 1024 * 1024
    vmem_limit = int(min(max(2 * block_bytes, 32 * 1024 * 1024), int(0.9 * vmem_cap)))

    flops = num_tiles * level * (2 * width * width * bth + 2 * width * bth * bth + width * bth)
    bytes_accessed = 4 * (batch * height * width * (level + 2)
                          + level * (width * width + bth * bth))
    cost = pl.CostEstimate(flops=flops, transcendentals=0, bytes_accessed=bytes_accessed)

    kernel = functools.partial(_uwt_kernel, level=level)
    out_shape = jax.ShapeDtypeStruct((level + 1, width, batch * height), jnp.float32)

    def build(single_buffer_ops: bool):
        op_kwargs = {"pipeline_mode": pl.Buffered(1)} if single_buffer_ops else {}
        grid_spec = pltpu.PrefetchScalarGridSpec(
            num_scalar_prefetch=0,
            grid=(num_tiles,),
            in_specs=[
                pl.BlockSpec((width, bth), lambda t: (0, t)),
                pl.BlockSpec((level, width, width), lambda t: (0, 0, 0), **op_kwargs),
                pl.BlockSpec((level, bth, bth), lambda t: (0, 0, 0), **op_kwargs),
            ],
            out_specs=pl.BlockSpec((level + 1, width, bth), lambda t: (0, 0, t)),
        )
        return pl.pallas_call(
            kernel,
            out_shape=out_shape,
            grid_spec=grid_spec,
            compiler_params=pltpu.CompilerParams(
                dimension_semantics=("parallel",), vmem_limit_bytes=vmem_limit),
            cost_estimate=cost,
        )

    try:
        # Primary path: constant operator stacks single-buffered (no wasted double-buffer VMEM).
        out_t = jax.block_until_ready(build(True)(xt, aw_cum, ah_cum_bdt))
    except Exception:
        # Fallback if this JAX build rejects pipeline_mode=Buffered(1): default double-buffering.
        out_t = jax.block_until_ready(build(False)(xt, aw_cum, ah_cum_bdt))

    # (J+1, W, B*H) -> (B, J+1, H, W): free reshape + one XLA transpose (layout plumbing).
    return jnp.transpose(out_t.reshape(level + 1, width, batch, height), (2, 0, 3, 1))


def _reference_uwt(x: np.ndarray, level: int) -> np.ndarray:
    """Direct NumPy port of the torch forward (5-tap dilated conv, reflect padding)."""
    w = B3_WEIGHTS.astype(np.float32)
    batch, height, width = x.shape

    def conv1d_reflect(a, d, axis):
        length = a.shape[axis]
        pad = 2 * d
        idx = np.arange(-pad, length + pad)
        idx = np.where(idx < 0, -idx, idx)
        idx = np.where(idx >= length, 2 * length - 2 - idx, idx)
        ap = np.take(a, idx, axis=axis)
        out = np.zeros_like(a)
        for k in range(5):
            sl = [slice(None)] * a.ndim
            sl[axis] = slice(k * d, k * d + length)
            out = out + w[k] * ap[tuple(sl)]
        return out

    c = x.astype(np.float32)
    outs = np.zeros((batch, level + 1, height, width), np.float32)
    for j in range(level):
        prev = c
        c = conv1d_reflect(c, 2 ** j, axis=1)  # H axis
        c = conv1d_reflect(c, 2 ** j, axis=2)  # W axis
        outs[:, j] = prev - c
    outs[:, level] = c
    return outs


if __name__ == "__main__":
    key = jax.random.PRNGKey(0)
    B, H, W = 16, 16, 16  # -> batch tile = 8, grid = 2, packed lane width = 128 (lane-dense)
    x = jax.random.normal(key, (B, H, W), dtype=jnp.float32)

    out = jax.block_until_ready(b3spline_uwt_approx1(x, level=LEVEL))

    assert out.shape == (B, LEVEL + 1, H, W)
    assert out.dtype == jnp.float32

    ref = _reference_uwt(np.asarray(x), LEVEL)
    # atol=2e-5: cumulative-operator / MXU f32 summation order differs from the tap-by-tap
    # NumPy reference (both are valid f32 evaluations of the same linear operator).
    np.testing.assert_allclose(np.asarray(out), ref, rtol=1e-5, atol=2e-5)

    print("KERNEL_OK")
</pallas_src>

<mosaic_0001>
module attributes {stable_mosaic.version = 11 : i64} {
  func.func @_uwt_kernel(%arg0: i32, %arg1: memref<16x128xf32, #tpu.memory_space<vmem>>, %arg2: memref<3x16x16xf32, #tpu.memory_space<vmem>>, %arg3: memref<3x128x128xf32, #tpu.memory_space<vmem>>, %arg4: memref<4x16x128xf32, #tpu.memory_space<vmem>>) attributes {dimension_semantics = [#tpu.dimension_semantics<parallel>], iteration_bounds = array<i64: 2>, scalar_prefetch = 0 : i64, scratch_operands = 0 : i64, tpu.core_type = #tpu.core_type<tc>, window_params = [{transform_indices = @transform_0, window_bounds = array<i64: 16, 128>}, {pipeline_mode = #tpu.pipeline_mode<synchronous>, transform_indices = @transform_1, window_bounds = array<i64: 3, 16, 16>}, {pipeline_mode = #tpu.pipeline_mode<synchronous>, transform_indices = @transform_2, window_bounds = array<i64: 3, 128, 128>}, {transform_indices = @transform_3, window_bounds = array<i64: 4, 16, 128>}]} {
    %c0 = arith.constant 0 : index
    %c0_0 = arith.constant 0 : index
    %0 = vector.load %arg1[%c0, %c0_0] : memref<16x128xf32, #tpu.memory_space<vmem>>, vector<16x128xf32>
    %c0_1 = arith.constant 0 : index
    %c0_2 = arith.constant 0 : index
    %c0_3 = arith.constant 0 : index
    %1 = vector.load %arg2[%c0_1, %c0_2, %c0_3] : memref<3x16x16xf32, #tpu.memory_space<vmem>>, vector<1x16x16xf32>
    %2 = vector.shape_cast %1 : vector<1x16x16xf32> to vector<16x16xf32>
    %cst = arith.constant dense<0.000000e+00> : vector<16x128xf32>
    %3 = tpu.matmul %2, %0, %cst {dimension_numbers = #tpu.dot_dimension_numbers<[1], [0], [0], [1], [0, 0, 1, 1], [], []>} : vector<16x16xf32>, vector<16x128xf32>, vector<16x128xf32> -> vector<16x128xf32>
    %c0_4 = arith.constant 0 : index
    %c0_5 = arith.constant 0 : index
    %c0_6 = arith.constant 0 : index
    %4 = vector.load %arg3[%c0_4, %c0_5, %c0_6] : memref<3x128x128xf32, #tpu.memory_space<vmem>>, vector<1x128x128xf32>
    %5 = vector.shape_cast %4 : vector<1x128x128xf32> to vector<128x128xf32>
    %cst_7 = arith.constant dense<0.000000e+00> : vector<16x128xf32>
    %6 = tpu.matmul %3, %5, %cst_7 {dimension_numbers = #tpu.dot_dimension_numbers<[1], [0], [0], [1], [0, 0, 1, 1], [], []>} : vector<16x128xf32>, vector<128x128xf32>, vector<16x128xf32> -> vector<16x128xf32>
    %7 = arith.subf %0, %6 : vector<16x128xf32>
    %c0_8 = arith.constant 0 : index
    %c0_9 = arith.constant 0 : index
    %c0_10 = arith.constant 0 : index
    %8 = vector.load %arg4[%c0_8, %c0_9, %c0_10] : memref<4x16x128xf32, #tpu.memory_space<vmem>>, vector<1x16x128xf32>
    %9 = vector.shape_cast %8 : vector<1x16x128xf32> to vector<16x128xf32>
    %10 = vector.shape_cast %7 : vector<16x128xf32> to vector<1x16x128xf32>
    tpu.vector_store %arg4[%c0_8, %c0_9, %c0_10], %10 {strides = array<i32>} : memref<4x16x128xf32, #tpu.memory_space<vmem>>, vector<1x16x128xf32>,
    %c1 = arith.constant 1 : index
    %c0_11 = arith.constant 0 : index
    %c0_12 = arith.constant 0 : index
    %11 = vector.load %arg2[%c1, %c0_11, %c0_12] : memref<3x16x16xf32, #tpu.memory_space<vmem>>, vector<1x16x16xf32>
    %12 = vector.shape_cast %11 : vector<1x16x16xf32> to vector<16x16xf32>
    %cst_13 = arith.constant dense<0.000000e+00> : vector<16x128xf32>
    %13 = tpu.matmul %12, %0, %cst_13 {dimension_numbers = #tpu.dot_dimension_numbers<[1], [0], [0], [1], [0, 0, 1, 1], [], []>} : vector<16x16xf32>, vector<16x128xf32>, vector<16x128xf32> -> vector<16x128xf32>
    %c1_14 = arith.constant 1 : index
    %c0_15 = arith.constant 0 : index
    %c0_16 = arith.constant 0 : index
    %14 = vector.load %arg3[%c1_14, %c0_15, %c0_16] : memref<3x128x128xf32, #tpu.memory_space<vmem>>, vector<1x128x128xf32>
    %15 = vector.shape_cast %14 : vector<1x128x128xf32> to vector<128x128xf32>
    %cst_17 = arith.constant dense<0.000000e+00> : vector<16x128xf32>
    %16 = tpu.matmul %13, %15, %cst_17 {dimension_numbers = #tpu.dot_dimension_numbers<[1], [0], [0], [1], [0, 0, 1, 1], [], []>} : vector<16x128xf32>, vector<128x128xf32>, vector<16x128xf32> -> vector<16x128xf32>
    %17 = arith.subf %6, %16 : vector<16x128xf32>
    %c1_18 = arith.constant 1 : index
    %c0_19 = arith.constant 0 : index
    %c0_20 = arith.constant 0 : index
    %18 = vector.load %arg4[%c1_18, %c0_19, %c0_20] : memref<4x16x128xf32, #tpu.memory_space<vmem>>, vector<1x16x128xf32>
    %19 = vector.shape_cast %18 : vector<1x16x128xf32> to vector<16x128xf32>
    %20 = vector.shape_cast %17 : vector<16x128xf32> to vector<1x16x128xf32>
    tpu.vector_store %arg4[%c1_18, %c0_19, %c0_20], %20 {strides = array<i32>} : memref<4x16x128xf32, #tpu.memory_space<vmem>>, vector<1x16x128xf32>,
    %c2 = arith.constant 2 : index
    %c0_21 = arith.constant 0 : index
    %c0_22 = arith.constant 0 : index
    %21 = vector.load %arg2[%c2, %c0_21, %c0_22] : memref<3x16x16xf32, #tpu.memory_space<vmem>>, vector<1x16x16xf32>
    %22 = vector.shape_cast %21 : vector<1x16x16xf32> to vector<16x16xf32>
    %cst_23 = arith.constant dense<0.000000e+00> : vector<16x128xf32>
    %23 = tpu.matmul %22, %0, %cst_23 {dimension_numbers = #tpu.dot_dimension_numbers<[1], [0], [0], [1], [0, 0, 1, 1], [], []>} : vector<16x16xf32>, vector<16x128xf32>, vector<16x128xf32> -> vector<16x128xf32>
    %c2_24 = arith.constant 2 : index
    %c0_25 = arith.constant 0 : index
    %c0_26 = arith.constant 0 : index
    %24 = vector.load %arg3[%c2_24, %c0_25, %c0_26] : memref<3x128x128xf32, #tpu.memory_space<vmem>>, vector<1x128x128xf32>
    %25 = vector.shape_cast %24 : vector<1x128x128xf32> to vector<128x128xf32>
    %cst_27 = arith.constant dense<0.000000e+00> : vector<16x128xf32>
    %26 = tpu.matmul %23, %25, %cst_27 {dimension_numbers = #tpu.dot_dimension_numbers<[1], [0], [0], [1], [0, 0, 1, 1], [], []>} : vector<16x128xf32>, vector<128x128xf32>, vector<16x128xf32> -> vector<16x128xf32>
    %27 = arith.subf %16, %26 : vector<16x128xf32>
    %c2_28 = arith.constant 2 : index
    %c0_29 = arith.constant 0 : index
    %c0_30 = arith.constant 0 : index
    %28 = vector.load %arg4[%c2_28, %c0_29, %c0_30] : memref<4x16x128xf32, #tpu.memory_space<vmem>>, vector<1x16x128xf32>
    %29 = vector.shape_cast %28 : vector<1x16x128xf32> to vector<16x128xf32>
    %30 = vector.shape_cast %27 : vector<16x128xf32> to vector<1x16x128xf32>
    tpu.vector_store %arg4[%c2_28, %c0_29, %c0_30], %30 {strides = array<i32>} : memref<4x16x128xf32, #tpu.memory_space<vmem>>, vector<1x16x128xf32>,
    %c3 = arith.constant 3 : index
    %c0_31 = arith.constant 0 : index
    %c0_32 = arith.constant 0 : index
    %31 = vector.load %arg4[%c3, %c0_31, %c0_32] : memref<4x16x128xf32, #tpu.memory_space<vmem>>, vector<1x16x128xf32>
    %32 = vector.shape_cast %31 : vector<1x16x128xf32> to vector<16x128xf32>
    %33 = vector.shape_cast %26 : vector<16x128xf32> to vector<1x16x128xf32>
    tpu.vector_store %arg4[%c3, %c0_31, %c0_32], %33 {strides = array<i32>} : memref<4x16x128xf32, #tpu.memory_space<vmem>>, vector<1x16x128xf32>,
    return
  }
  func.func @transform_0(%arg0: i32) -> (i32, i32) {
    %c0_i32 = arith.constant 0 : i32
    %c0_i32_0 = arith.constant 0 : i32
    return %c0_i32, %arg0 : i32, i32
  }
  func.func @transform_1(%arg0: i32) -> (i32, i32, i32) {
    %c0_i32 = arith.constant 0 : i32
    %c0_i32_0 = arith.constant 0 : i32
    %c0_i32_1 = arith.constant 0 : i32
    %c0_i32_2 = arith.constant 0 : i32
    return %c0_i32, %c0_i32_0, %c0_i32_1 : i32, i32, i32
  }
  func.func @transform_2(%arg0: i32) -> (i32, i32, i32) {
    %c0_i32 = arith.constant 0 : i32
    %c0_i32_0 = arith.constant 0 : i32
    %c0_i32_1 = arith.constant 0 : i32
    %c0_i32_2 = arith.constant 0 : i32
    return %c0_i32, %c0_i32_0, %c0_i32_1 : i32, i32, i32
  }
  func.func @transform_3(%arg0: i32) -> (i32, i32, i32) {
    %c0_i32 = arith.constant 0 : i32
    %c0_i32_0 = arith.constant 0 : i32
    %c0_i32_1 = arith.constant 0 : i32
    return %c0_i32, %c0_i32_0, %arg0 : i32, i32, i32
  }
}

module attributes {stable_mosaic.version = 11 : i64} {
  func.func @_uwt_kernel(%arg0: i32, %arg1: memref<16x128xf32, #tpu.memory_space<vmem>>, %arg2: memref<3x16x16xf32, #tpu.memory_space<vmem>>, %arg3: memref<3x128x128xf32, #tpu.memory_space<vmem>>, %arg4: memref<4x16x128xf32, #tpu.memory_space<vmem>>) attributes {dimension_semantics = [#tpu.dimension_semantics<parallel>], iteration_bounds = array<i64: 2>, scalar_prefetch = 0 : i64, scratch_operands = 0 : i64, tpu.core_type = #tpu.core_type<tc>, window_params = [{transform_indices = @transform_0, window_bounds = array<i64: 16, 128>}, {pipeline_mode = #tpu.pipeline_mode<synchronous>, transform_indices = @transform_1, window_bounds = array<i64: 3, 16, 16>}, {pipeline_mode = #tpu.pipeline_mode<synchronous>, transform_indices = @transform_2, window_bounds = array<i64: 3, 128, 128>}, {transform_indices = @transform_3, window_bounds = array<i64: 4, 16, 128>}]} {
    %c0 = arith.constant 0 : index
    %c0_0 = arith.constant 0 : index
    %0 = vector.load %arg1[%c0, %c0_0] : memref<16x128xf32, #tpu.memory_space<vmem>>, vector<16x128xf32>
    %c0_1 = arith.constant 0 : index
    %c0_2 = arith.constant 0 : index
    %c0_3 = arith.constant 0 : index
    %1 = vector.load %arg2[%c0_1, %c0_2, %c0_3] : memref<3x16x16xf32, #tpu.memory_space<vmem>>, vector<1x16x16xf32>
    %2 = vector.shape_cast %1 : vector<1x16x16xf32> to vector<16x16xf32>
    %cst = arith.constant dense<0.000000e+00> : vector<16x128xf32>
    %3 = tpu.matmul %2, %0, %cst {dimension_numbers = #tpu.dot_dimension_numbers<[1], [0], [0], [1], [0, 0, 1, 1], [], []>} : vector<16x16xf32>, vector<16x128xf32>, vector<16x128xf32> -> vector<16x128xf32>
    %c0_4 = arith.constant 0 : index
    %c0_5 = arith.constant 0 : index
    %c0_6 = arith.constant 0 : index
    %4 = vector.load %arg3[%c0_4, %c0_5, %c0_6] : memref<3x128x128xf32, #tpu.memory_space<vmem>>, vector<1x128x128xf32>
    %5 = vector.shape_cast %4 : vector<1x128x128xf32> to vector<128x128xf32>
    %cst_7 = arith.constant dense<0.000000e+00> : vector<16x128xf32>
    %6 = tpu.matmul %3, %5, %cst_7 {dimension_numbers = #tpu.dot_dimension_numbers<[1], [0], [0], [1], [0, 0, 1, 1], [], []>} : vector<16x128xf32>, vector<128x128xf32>, vector<16x128xf32> -> vector<16x128xf32>
    %7 = arith.subf %0, %6 : vector<16x128xf32>
    %c0_8 = arith.constant 0 : index
    %c0_9 = arith.constant 0 : index
    %c0_10 = arith.constant 0 : index
    %8 = vector.load %arg4[%c0_8, %c0_9, %c0_10] : memref<4x16x128xf32, #tpu.memory_space<vmem>>, vector<1x16x128xf32>
    %9 = vector.shape_cast %8 : vector<1x16x128xf32> to vector<16x128xf32>
    %10 = vector.shape_cast %7 : vector<16x128xf32> to vector<1x16x128xf32>
    tpu.vector_store %arg4[%c0_8, %c0_9, %c0_10], %10 {strides = array<i32>} : memref<4x16x128xf32, #tpu.memory_space<vmem>>, vector<1x16x128xf32>,
    %c1 = arith.constant 1 : index
    %c0_11 = arith.constant 0 : index
    %c0_12 = arith.constant 0 : index
    %11 = vector.load %arg2[%c1, %c0_11, %c0_12] : memref<3x16x16xf32, #tpu.memory_space<vmem>>, vector<1x16x16xf32>
    %12 = vector.shape_cast %11 : vector<1x16x16xf32> to vector<16x16xf32>
    %cst_13 = arith.constant dense<0.000000e+00> : vector<16x128xf32>
    %13 = tpu.matmul %12, %0, %cst_13 {dimension_numbers = #tpu.dot_dimension_numbers<[1], [0], [0], [1], [0, 0, 1, 1], [], []>} : vector<16x16xf32>, vector<16x128xf32>, vector<16x128xf32> -> vector<16x128xf32>
    %c1_14 = arith.constant 1 : index
    %c0_15 = arith.constant 0 : index
    %c0_16 = arith.constant 0 : index
    %14 = vector.load %arg3[%c1_14, %c0_15, %c0_16] : memref<3x128x128xf32, #tpu.memory_space<vmem>>, vector<1x128x128xf32>
    %15 = vector.shape_cast %14 : vector<1x128x128xf32> to vector<128x128xf32>
    %cst_17 = arith.constant dense<0.000000e+00> : vector<16x128xf32>
    %16 = tpu.matmul %13, %15, %cst_17 {dimension_numbers = #tpu.dot_dimension_numbers<[1], [0], [0], [1], [0, 0, 1, 1], [], []>} : vector<16x128xf32>, vector<128x128xf32>, vector<16x128xf32> -> vector<16x128xf32>
    %17 = arith.subf %6, %16 : vector<16x128xf32>
    %c1_18 = arith.constant 1 : index
    %c0_19 = arith.constant 0 : index
    %c0_20 = arith.constant 0 : index
    %18 = vector.load %arg4[%c1_18, %c0_19, %c0_20] : memref<4x16x128xf32, #tpu.memory_space<vmem>>, vector<1x16x128xf32>
    %19 = vector.shape_cast %18 : vector<1x16x128xf32> to vector<16x128xf32>
    %20 = vector.shape_cast %17 : vector<16x128xf32> to vector<1x16x128xf32>
    tpu.vector_store %arg4[%c1_18, %c0_19, %c0_20], %20 {strides = array<i32>} : memref<4x16x128xf32, #tpu.memory_space<vmem>>, vector<1x16x128xf32>,
    %c2 = arith.constant 2 : index
    %c0_21 = arith.constant 0 : index
    %c0_22 = arith.constant 0 : index
    %21 = vector.load %arg2[%c2, %c0_21, %c0_22] : memref<3x16x16xf32, #tpu.memory_space<vmem>>, vector<1x16x16xf32>
    %22 = vector.shape_cast %21 : vector<1x16x16xf32> to vector<16x16xf32>
    %cst_23 = arith.constant dense<0.000000e+00> : vector<16x128xf32>
    %23 = tpu.matmul %22, %0, %cst_23 {dimension_numbers = #tpu.dot_dimension_numbers<[1], [0], [0], [1], [0, 0, 1, 1], [], []>} : vector<16x16xf32>, vector<16x128xf32>, vector<16x128xf32> -> vector<16x128xf32>
    %c2_24 = arith.constant 2 : index
    %c0_25 = arith.constant 0 : index
    %c0_26 = arith.constant 0 : index
    %24 = vector.load %arg3[%c2_24, %c0_25, %c0_26] : memref<3x128x128xf32, #tpu.memory_space<vmem>>, vector<1x128x128xf32>
    %25 = vector.shape_cast %24 : vector<1x128x128xf32> to vector<128x128xf32>
    %cst_27 = arith.constant dense<0.000000e+00> : vector<16x128xf32>
    %26 = tpu.matmul %23, %25, %cst_27 {dimension_numbers = #tpu.dot_dimension_numbers<[1], [0], [0], [1], [0, 0, 1, 1], [], []>} : vector<16x128xf32>, vector<128x128xf32>, vector<16x128xf32> -> vector<16x128xf32>
    %27 = arith.subf %16, %26 : vector<16x128xf32>
    %c2_28 = arith.constant 2 : index
    %c0_29 = arith.constant 0 : index
    %c0_30 = arith.constant 0 : index
    %28 = vector.load %arg4[%c2_28, %c0_29, %c0_30] : memref<4x16x128xf32, #tpu.memory_space<vmem>>, vector<1x16x128xf32>
    %29 = vector.shape_cast %28 : vector<1x16x128xf32> to vector<16x128xf32>
    %30 = vector.shape_cast %27 : vector<16x128xf32> to vector<1x16x128xf32>
    tpu.vector_store %arg4[%c2_28, %c0_29, %c0_30], %30 {strides = array<i32>} : memref<4x16x128xf32, #tpu.memory_space<vmem>>, vector<1x16x128xf32>,
    %c3 = arith.constant 3 : index
    %c0_31 = arith.constant 0 : index
    %c0_32 = arith.constant 0 : index
    %31 = vector.load %arg4[%c3, %c0_31, %c0_32] : memref<4x16x128xf32, #tpu.memory_space<vmem>>, vector<1x16x128xf32>
    %32 = vector.shape_cast %31 : vector<1x16x128xf32> to vector<16x128xf32>
    %33 = vector.shape_cast %26 : vector<16x128xf32> to vector<1x16x128xf32>
    tpu.vector_store %arg4[%c3, %c0_31, %c0_32], %33 {strides = array<i32>} : memref<4x16x128xf32, #tpu.memory_space<vmem>>, vector<1x16x128xf32>,
    return
  }
  func.func @transform_0(%arg0: i32) -> (i32, i32) {
    %c0_i32 = arith.constant 0 : i32
    %c0_i32_0 = arith.constant 0 : i32
    return %c0_i32, %arg0 : i32, i32
  }
  func.func @transform_1(%arg0: i32) -> (i32, i32, i32) {
    %c0_i32 = arith.constant 0 : i32
    %c0_i32_0 = arith.constant 0 : i32
    %c0_i32_1 = arith.constant 0 : i32
    %c0_i32_2 = arith.constant 0 : i32
    return %c0_i32, %c0_i32_0, %c0_i32_1 : i32, i32, i32
  }
  func.func @transform_2(%arg0: i32) -> (i32, i32, i32) {
    %c0_i32 = arith.constant 0 : i32
    %c0_i32_0 = arith.constant 0 : i32
    %c0_i32_1 = arith.constant 0 : i32
    %c0_i32_2 = arith.constant 0 : i32
    return %c0_i32, %c0_i32_0, %c0_i32_1 : i32, i32, i32
  }
  func.func @transform_3(%arg0: i32) -> (i32, i32, i32) {
    %c0_i32 = arith.constant 0 : i32
    %c0_i32_0 = arith.constant 0 : i32
    %c0_i32_1 = arith.constant 0 : i32
    return %c0_i32, %c0_i32_0, %arg0 : i32, i32, i32
  }
}

</mosaic_0001>

<bundles_post_ra>
// kernel: tpu_custom_call.1
= control target key start
LH: loop header
LB: loop body
LE: loop exit
PB: predicated region body
PF: predicated region fallthrough
CT: control target
= control target key end

     0   :  { %8 = vsyncpa [#allocation3], 0  ;;  %s1714_s0 = inlined_call_operand.hbm [shape: f32[16,256], index: 0, kind: input, shape index: {}]   ;;  %s1715_s1 = inlined_call_operand.hbm [shape: f32[3,16,16], index: 1, kind: input, shape index: {}]   ;;  %s1716_s2 = inlined_call_operand.hbm [shape: f32[3,128,128], index: 2, kind: input, shape index: {}]   ;;  %s1717_s3 = inlined_call_operand.hbm [shape: f32[4,16,256], index: 3, kind: output, shape index: {}]  }
   0x1   :  { %10 = vsyncpa [#allocation3 + $0x1], 0 }
   0x2   :  { %11 = vsyncpa [#allocation6], 0 }
   0x3   :  { %12 = vsyncpa [#allocation4], 0 }
   0x4   :  { %14 = vsyncpa [#allocation4 + $0x1], 0  ;;  %s1457_s12 = smov 0   ;;  %s1459_s13 = smov 0  }
   0x5   :  { %s1461_s14 = smov 0   ;;  %s1463_s15 = smov 0  }
   0x6 LB: > { %s1478_s16 = sadd.s32 4294967295, %s1425_s15   ;;  %s868_s17 = sadd.s32 4294967294, %s1425_s15   ;;  %s1425_s15 = sphi %s1463_s15, %s1743_s15   ;;  %s1421_s14 = sphi %s1461_s14, %s1742_s14   ;;  %s1417_s13 = sphi %s1459_s13, %s1741_s13   ;;  %s1413_s12 = sphi %s1457_s12, %s1740_s12  }
   0x7   : > { %s1482_s18 = sadd.s32 1, %s1425_s15   ;;  %s27_s19 = sadd.s32 1, %s1421_s14 }
   0x8   : > { %s24_s20 = ssub.s32 %s1425_s15, %s1482_s18  ;;  %p34_p0 = scmp.ne.s32.totalorder %s1421_s14, %s1417_s13 }
   0x9   : > { %p25_p1 = scmp.eq.s32.totalorder %s24_s20, 0  ;;  %p35_p2 = scmp.eq.s32.totalorder %s1425_s15, 0 }
   0xa   : > { %p40_p3 = scmp.ne.s32.totalorder %s1417_s13, %s1413_s12  ;;  %p1718_p4 = scmp.eq.s32.totalorder %s1478_s16, 0 }
   0xb   : > { %s1494_s21 = scalar_select %p25_p1, %s1421_s14, %s27_s19  }
   0xc   : > { %p1496_p5 = por %p35_p2, %p34_p0  ;;  %p1502_p6 = por %p1718_p4, %p40_p3 }
   0xd   : > { %p106_p7 = scmp.eq.s32.totalorder %s1478_s16, 1  ;;  %p112_p8 = scmp.eq.s32.totalorder %s868_s17, 1 }
   0xe   : > { %s1723_s22 = scalar_select %p1496_p5, 1, 0 }
   0xf   : > { %s1724_s23 = scalar_select %p1502_p6, 1, 0 }
  0x10   : > { %p869_p9 = scmp.ge.s32.totalorder %s1425_s15, 1  ;;  %p119_p10 = scmp.lt.s32.totalorder %s1425_s15, 3 }
  0x11   : > { %p1509_p11 = por %p106_p7, %p34_p0  ;;  %p1513_p12 = por %p112_p8, %p40_p3 }
  0x12   : > { %p1517_p13 = pnand %p869_p9, %p119_p10  ;;  %s1427_s27 = smov [#allocation5]  }
  0x13   : > { %s1725_s24 = scalar_select %p1509_p11, 1, 0 }
  0x14   : > { %s1726_s25 = scalar_select %p1513_p12, 1, 0 }
  0x15   : > { %s1727_s26 = scalar_select %p1517_p13, 1, 0 }
  0x16   : > { %p1208_p1 = pneg %p1517_p13  ;;  %s131_s28 = sshll.u32 %s1427_s27, 4  ;;  %s132_s28 = int_to_ptr.vmem [resolvable:$true] %s131_s28 }
  0x17   : > { %s1428_s30 = smov [#allocation7]   ;;  %s1269_s7 = scalar_lea.hbm %s1715_s1, 768 }
  0x18   : > { %p1525_p2 = pnand %p1208_p1, %p1718_p4  ;;  %s144_s4 = sshll.u32 %s1428_s30, 4  ;;  %s145_s4 = int_to_ptr.vmem [resolvable:$true] %s144_s4 }
  0x19   : > { %p1270_p7 = scmp.ne.s32.totalorder %s1715_s1, %s1269_s7  ;;  %p1276_p1 = scmp.lt.u32.totalorder %s1269_s7, %s1715_s1 }
  0x1a   : > { %p1271_p8 = pneg %p1525_p2 }
  0x1c   : > { %p1272_p9 = pnand %p1271_p8, %p1270_p7 }
  0x1e   : > { %p1273_p10 = pneg %p1272_p9 }
  0x20   : > { %p1278_p0 = pnand %p1276_p1, %p1273_p10 }
  0x22   : > { %1281 = shalt.err (!%p1278_p0)
}
  0x23   : > { %s1282_s17 = scalar_lea.vmem %s132_s28, 768  ;;  %p1290_p11 = scmp.lt.s32.totalorder %s132_s28, %s132_s28 }
  0x24   : > { %p1283_p4 = scmp.ne.s32.totalorder %s132_s28, %s1282_s17  ;;  %p1291_p6 = scmp.lt.s32.totalorder %s1282_s17, %s1282_s17 }
  0x26   : > { %p1285_p3 = pnand %p1283_p4, %p1271_p8  ;;  %p1292_p13 = por %p1291_p6, %p1290_p11 }
  0x28   : > { %p1286_p12 = pneg %p1285_p3 }
  0x2a   : > { %p1293_p5 = pnand %p1292_p13, %p1286_p12 }
  0x2c   : > { %1296 = shalt.err (!%p1293_p5)
}
  0x2d   : > { %s1429_s19 = smov 128   ;;  %s1430_s20 = smov 8  }
  0x2e   : > { %1211 = dma.hbm_to_vmem [thread:$0]  (!%p1525_p2), %s1715_s1, 768, %s132_s28, [#allocation6], %s1429_s19, %s1429_s19, %s1430_s20  }
  0x2f   : > { %p1729_p4 = scmp.ne.s32.totalorder %s1723_s22, 0  ;;  %p1730_p0 = scmp.lt.s32.totalorder %s1425_s15, 2 }
  0x30   : > { %s1297_s8 = scalar_lea.hbm %s1716_s2, 6144 }
  0x31   : > { %p1560_p3 = pnand %p1730_p0, %p1729_p4  ;;  %p1298_p5 = scmp.ne.s32.totalorder %s1716_s2, %s1297_s8 }
  0x32   : > { %p1304_p12 = scmp.lt.u32.totalorder %s1297_s8, %s1716_s2 }
  0x33   : > { %s1731_s5 = scalar_select %p1560_p3, 1, 0 }
  0x34   : > { %p1300_p6 = pnand %p1298_p5, %p1271_p8 }
  0x36   : > { %p1301_p11 = pneg %p1300_p6 }
  0x38   : > { %p1306_p13 = pnand %p1304_p12, %p1301_p11 }
  0x3a   : > { %1309 = shalt.err (!%p1306_p13)
}
  0x3b   : > { %s1310_s11 = scalar_lea.vmem %s145_s4, 6144  ;;  %p1318_p1 = scmp.lt.s32.totalorder %s145_s4, %s145_s4 }
  0x3c   : > { %p1311_p7 = scmp.ne.s32.totalorder %s145_s4, %s1310_s11  ;;  %p1319_p4 = scmp.lt.s32.totalorder %s1310_s11, %s1310_s11 }
  0x3e   : > { %p1313_p9 = pnand %p1311_p7, %p1271_p8  ;;  %p1320_p0 = por %p1319_p4, %p1318_p1 }
  0x40   : > { %p1314_p10 = pneg %p1313_p9 }
  0x42   : > { %p1321_p3 = pnand %p1320_p0, %p1314_p10 }
  0x44   : > { %1324 = shalt.err (!%p1321_p3)
}
  0x45   : > { %1214 = dma.hbm_to_vmem [thread:$0]  (!%p1525_p2), %s1716_s2, 6144, %s145_s4, [#allocation6], %s1429_s19, %s1429_s19, %s1430_s20  }
  0x46   : > { %s158_s30 = sand.u32 1, %s1421_s14   ;;  %s874_s7 = sshll.u32 %s1425_s15, 7 }
  0x47   : > { %s873_s6 = sshll.u32 %s158_s30, 4  ;;  %s1592_s10 = scalar_lea.hbm %s1714_s0, %s874_s7 }
  0x48   : > { %s162_s29 = scalar_lea.vmem [#allocation2], %s873_s6  ;;  %s1596_s22 = scalar_lea.sflag [#allocation3], %s158_s30 }
  0x49   : > { %s168_s28 = sshll.u32 %s162_s29, 4  ;;  %s1325_s11 = scalar_lea.hbm %s1592_s10, 256  ;;  %s1594_s28 = int_to_ptr.vmem [resolvable:$true] %s168_s28 }
  0x4a   : > { %p1326_p2 = scmp.ne.s32.totalorder %s1592_s10, %s1325_s11  ;;  %p1732_p8 = scmp.ne.s32.totalorder %s1731_s5, 0 }
  0x4b   : > { %s1330_s27 = scalar_lea.hbm %s1714_s0, 512  ;;  %p1331_p11 = scmp.lt.u32.totalorder %s1592_s10, %s1714_s0 }
  0x4c   : > { %p1327_p3 = pneg %p1732_p8  ;;  %p1332_p12 = scmp.lt.u32.totalorder %s1330_s27, %s1325_s11 }
  0x4d   : > { %p1334_p7 = scmp.lt.u32.totalorder %s1325_s11, %s1592_s10 }
  0x4e   : > { %p1328_p5 = pnand %p1327_p3, %p1326_p2  ;;  %p1333_p13 = por %p1332_p12, %p1331_p11 }
  0x50   : > { %p1329_p6 = pneg %p1328_p5  ;;  %p1335_p9 = por %p1334_p7, %p1333_p13 }
  0x52   : > { %p1336_p10 = pnand %p1335_p9, %p1329_p6 }
  0x54   : > { %1339 = shalt.err (!%p1336_p10)
}
  0x55   : > { %s1340_s30 = scalar_lea.vmem %s1594_s28, 256  ;;  %s1431_s6 = smov [#allocation2]  }
  0x56   : > { %p1341_p1 = scmp.ne.s32.totalorder %s1594_s28, %s1340_s30  ;;  %s1345_s9 = sshll.u32 %s1431_s6, 4  ;;  %s1346_s9 = int_to_ptr.vmem [resolvable:$false] %s1345_s9 }
  0x57   : > { %s1347_s29 = scalar_lea.vmem %s1346_s9, 512  ;;  %p1348_p2 = scmp.lt.s32.totalorder %s1594_s28, %s1346_s9 }
  0x58   : > { %p1343_p4 = pnand %p1341_p1, %p1327_p3  ;;  %p1349_p5 = scmp.lt.s32.totalorder %s1347_s29, %s1340_s30 }
  0x5a   : > { %p1344_p0 = pneg %p1343_p4  ;;  %p1350_p11 = por %p1349_p5, %p1348_p2 }
  0x5c   : > { %p1351_p12 = pnand %p1350_p11, %p1344_p0 }
  0x5e   : > { %1354 = shalt.err (!%p1351_p12)
}
  0x5f   : > { %s1432_s11 = smov 256   ;;  %p1733_p3 = scmp.ne.s32.totalorder %s1727_s26, 0 }
  0x60   : > { %1218 = dma.hbm_to_vmem [thread:$0]  (!%p1732_p8), %s1592_s10, 256, %s1594_s28, %s1596_s22, %s1432_s11, %s1429_s19, %s1430_s20  }
  0x61   : > { %180 = sbr.rel (%p1733_p3) target bundleno = 782 (0x30e), region = 32  ;;  %s1629_s4 = sand.u32 (!%p1733_p3), 1, %s1417_s13  }
  0x62   : > { %s876_s17 = sshll.u32 (!%p1733_p3), %s1629_s4, 4  ;;  %s183_s27 = scalar_lea.sflag (!%p1733_p3), [#allocation3], %s1629_s4 }
  0x63   : > { %s186_s7 = scalar_lea.vmem (!%p1733_p3), [#allocation2], %s876_s17  ;;  %p1734_p6 = scmp.ne.s32.totalorder (!%p1733_p3), %s1724_s23, 0 }
  0x68   : > { %1400 = dma.done.wait (%p1734_p6), %s183_s27, 256  }
  0x69   : > { %1402 = vsyncadd (%p1734_p6), %s183_s27, 4294967040  ;;  %p1735_p13 = scmp.eq.s32.totalorder %s1478_s16, 0 }
  0x6b   : > { %1404 = dma.done.wait (%p1735_p13), [#allocation6], 6912   ;;  %p1736_p8 = pmov %p1735_p13 }
  0x6c   : > { %vm221_vm0 = vcmask 130048   ;;  %v1641_v0 = vld [vmem:[%s186_s7] sm:$0xff]  ;;  %v1643_v1 = vld [vmem:[%s186_s7 + $0x8] sm:$0xff]  ;;  %s879_s23 = sshll.u32 %s1629_s4, 6  ;;  %s893_s20 = sshll.u32 %s1478_s16, 7 }
  0x6d   : > { %1406 = vsyncadd (%p1736_p8), [#allocation6], 4294960384  ;;  %v219_v2 = vld [vmem:[#allocation5] sm:$0xff]  ;;  %v1647_v3 = vpack.c.bf16 %v1643_v1, %v1641_v0  ;;  %v303_v4 = vld [vmem:[#allocation7] sm:$0xff]  ;;  %s216_s26 = scalar_lea.vmem [#allocation8], %s879_s23  ;;  %s1670_s28 = scalar_lea.hbm %s1717_s3, %s893_s20 }
  0x6e   : > { %966 = vmatprep.mubr.msk.f32.mxu0 %vm221_vm0, %v219_v2  ;;  %v304_v5 = vld [vmem:[#allocation7 + $0x8] sm:$0xff]  ;;  %v305_v6 = vld [vmem:[#allocation7 + $0x10] sm:$0xff]  ;;  %v306_v8 = vld [vmem:[#allocation7 + $0x18] sm:$0xff]  ;;  %s776_s19 = sshll.u32 %s216_s26, 4  ;;  %s764_s22 = scalar_lea.sflag [#allocation4], %s1629_s4  ;;  %s1665_s19 = int_to_ptr.vmem [resolvable:$true] %s776_s19 }
  0x6f   : > { %1089 = vmatprep.subr.bf16.mxu0 %v1647_v3  ;;  %v1092_v7 = vpack.c.bf16 %v304_v5, %v303_v4  ;;  %v483_v9 = vld [vmem:[#allocation7 + $0x80] sm:$0xff]  ;;  %v484_v10 = vld [vmem:[#allocation7 + $0x88] sm:$0xff]  ;;  %v220_v11 = vld [vmem:[#allocation5 + $0x8] sm:$0xff]  ;;  %v1096_v12 = vpack.c.bf16 %v306_v8, %v305_v6  ;;  %s1355_s16 = scalar_lea.vmem %s1665_s19, 1024  ;;  %p1737_p9 = scmp.ne.s32.totalorder %s1725_s24, 0 }
  0x70   : > { %1091 = vmatpush3.bf16.msra.mxu0 %v1647_v3  ;;  %v307_v13 = vld [vmem:[#allocation7 + $0x20] sm:$0xff]  ;;  %v308_v14 = vld [vmem:[#allocation7 + $0x28] sm:$0xff]  ;;  %v1128_v16 = vpack.c.bf16 %v484_v10, %v483_v9  ;;  %v485_v17 = vld [vmem:[#allocation7 + $0x90] sm:$0xff]  ;;  %p1356_p7 = scmp.ne.s32.totalorder %s1665_s19, %s1355_s16  ;;  %s1433_s8 = smov [#allocation8]  }
  0x71   : > { %1125 = vmatprep.subr.bf16.mxu0 %v1647_v3  ;;  %v399_v15 = vld [vmem:[#allocation5 + $0x10] sm:$0xff]  ;;  %1093 = vmatprep.subr.bf16.mxu1 %v1092_v7  ;;  %v486_v18 = vld [vmem:[#allocation7 + $0x98] sm:$0xff]  ;;  %v1100_v19 = vpack.c.bf16 %v308_v14, %v307_v13  ;;  %v400_v20 = vld [vmem:[#allocation5 + $0x18] sm:$0xff]  ;;  %s1359_s30 = sshll.u32 %s1433_s8, 4  ;;  %s1360_s30 = int_to_ptr.vmem [resolvable:$false] %s1359_s30 }
  0x72   : > { %1095 = vmatpush3.bf16.msra.mxu1 %v1092_v7  ;;  %v309_v21 = vld [vmem:[#allocation7 + $0x30] sm:$0xff]  ;;  %v310_v22 = vld [vmem:[#allocation7 + $0x38] sm:$0xff]  ;;  %v1132_v23 = vpack.c.bf16 %v486_v18, %v485_v17  ;;  %v487_v24 = vld [vmem:[#allocation7 + $0xa0] sm:$0xff]  ;;  %p1357_p10 = pnand %p1356_p7, %p1737_p9  ;;  %s1361_s6 = scalar_lea.vmem %s1360_s30, 2048 }
  0x73   : > { %967 = vmatmul.mubr.msk.f32.vlgmr.msra.gmra.mrb[0].mxu0 %vm221_vm0, %v220_v11  ;;  %1097 = vmatprep.subr.bf16.mxu1 %v1096_v12  ;;  %v488_v25 = vld [vmem:[#allocation7 + $0xa8] sm:$0xff]  ;;  %v1104_v26 = vpack.c.bf16 %v310_v22, %v309_v21  ;;  %v311_v27 = vld [vmem:[#allocation7 + $0x40] sm:$0xff]  ;;  %v489_v30 = vld [vmem:[#allocation7 + $0xb0] sm:$0xff]  ;;  %p1362_p4 = scmp.lt.s32.totalorder %s1665_s19, %s1360_s30  ;;  %p1363_p0 = scmp.lt.s32.totalorder %s1361_s6, %s1355_s16 }
  0x74   : > { %1127 = vmatpush3.bf16.msra.mxu0 %v1647_v3  ;;  %1008 = vmatprep.mubr.msk.f32.mxu0 %vm221_vm0, %v399_v15  ;;  %v312_v28 = vld [vmem:[#allocation7 + $0x48] sm:$0xff]  ;;  %v1136_v29 = vpack.c.bf16 %v488_v25, %v487_v24  ;;  %v490_v31 = vld [vmem:[#allocation7 + $0xb8] sm:$0xff]  ;;  %v313_v33 = vld [vmem:[#allocation7 + $0x50] sm:$0xff]  ;;  %p1358_p1 = pneg %p1357_p10 }
  0x75   : > { %1129 = vmatprep.subr.bf16.mxu0 %v1128_v16  ;;  %v1108_v32 = vpack.c.bf16 %v312_v28, %v311_v27  ;;  %v314_v34 = vld [vmem:[#allocation7 + $0x58] sm:$0xff]  ;;  %v1140_v35 = vpack.c.bf16 %v490_v31, %v489_v30  ;;  %v491_v36 = vld [vmem:[#allocation7 + $0xc0] sm:$0xff]  ;;  %v492_v37 = vld [vmem:[#allocation7 + $0xc8] sm:$0xff]  ;;  %p1364_p2 = por %p1363_p0, %p1362_p4 }
  0x76   : > { %1099 = vmatpush3.bf16.msra.mxu1 %v1096_v12  ;;  %v1112_v38 = vpack.c.bf16 %v314_v34, %v313_v33  ;;  %v315_v39 = vld [vmem:[#allocation7 + $0x60] sm:$0xff]  ;;  %v316_v40 = vld [vmem:[#allocation7 + $0x68] sm:$0xff]  ;;  %v1144_v41 = vpack.c.bf16 %v492_v37, %v491_v36  ;;  %v493_v42 = vld [vmem:[#allocation7 + $0xd0] sm:$0xff] }
  0x77   : > { %1009 = vmatmul.mubr.msk.f32.vlgmr.msra.gmra.mrb[2].mxu0 %vm221_vm0, %v400_v20  ;;  %1101 = vmatprep.subr.bf16.mxu1 %v1100_v19  ;;  %v494_v43 = vld [vmem:[#allocation7 + $0xd8] sm:$0xff]  ;;  %v1116_v44 = vpack.c.bf16 %v316_v40, %v315_v39  ;;  %v317_v45 = vld [vmem:[#allocation7 + $0x70] sm:$0xff]  ;;  %v495_v48 = vld [vmem:[#allocation7 + $0xe0] sm:$0xff]  ;;  %p1365_p5 = pnand %p1364_p2, %p1358_p1 }
  0x78   : > { %1131 = vmatpush3.bf16.msra.mxu0 %v1128_v16  ;;  %v318_v46 = vld [vmem:[#allocation7 + $0x78] sm:$0xff]  ;;  %v1148_v47 = vpack.c.bf16 %v494_v43, %v493_v42  ;;  %v496_v49 = vld [vmem:[#allocation7 + $0xe8] sm:$0xff]  ;;  %v497_v52 = vld [vmem:[#allocation7 + $0xf0] sm:$0xff] }
  0x79   : > { %1133 = vmatprep.subr.bf16.mxu0 %v1132_v23  ;;  %v1120_v50 = vpack.c.bf16 %v318_v46, %v317_v45  ;;  %v1152_v51 = vpack.c.bf16 %v496_v49, %v495_v48  ;;  %v498_v53 = vld [vmem:[#allocation7 + $0xf8] sm:$0xff]  ;;  %v664_v55 = vld [vmem:[#allocation7 + $0x100] sm:$0xff]  ;;  %v665_v56 = vld [vmem:[#allocation7 + $0x108] sm:$0xff] }
  0x7a   : > { %1103 = vmatpush3.bf16.msra.mxu1 %v1100_v19  ;;  %v1156_v54 = vpack.c.bf16 %v498_v53, %v497_v52  ;;  %v1164_v57 = vpack.c.bf16 %v665_v56, %v664_v55  ;;  %v666_v58 = vld [vmem:[#allocation7 + $0x110] sm:$0xff]  ;;  %v667_v59 = vld [vmem:[#allocation7 + $0x118] sm:$0xff]  ;;  %v668_v63 = vld [vmem:[#allocation7 + $0x120] sm:$0xff] }
  0x7b   : > { %1105 = vmatprep.subr.bf16.mxu1 %v1104_v26  ;;  %v1168_v62 = vpack.c.bf16 %v667_v59, %v666_v58  ;;  %v669_v2 = vld [vmem:[#allocation7 + $0x128] sm:$0xff]  ;;  %v580_v6 = vld [vmem:[#allocation5 + $0x20] sm:$0xff]  ;;  %v671_v9 = vld [vmem:[#allocation7 + $0x138] sm:$0xff] }
  0x7c   : > { %1135 = vmatpush3.bf16.msra.mxu0 %v1132_v23  ;;  %v1172_v7 = vpack.c.bf16 %v669_v2, %v668_v63  ;;  %v670_v8 = vld [vmem:[#allocation7 + $0x130] sm:$0xff]  ;;  %v581_v10 = vld [vmem:[#allocation5 + $0x28] sm:$0xff]  ;;  %v672_v12 = vld [vmem:[#allocation7 + $0x140] sm:$0xff] }
  0x7d   : > { %1137 = vmatprep.subr.bf16.mxu0 %v1136_v29  ;;  %v1176_v11 = vpack.c.bf16 %v671_v9, %v670_v8  ;;  %v673_v13 = vld [vmem:[#allocation7 + $0x148] sm:$0xff]  ;;  %v674_v15 = vld [vmem:[#allocation7 + $0x150] sm:$0xff]  ;;  %v675_v16 = vld [vmem:[#allocation7 + $0x158] sm:$0xff] }
  0x7e   : > { %1107 = vmatpush3.bf16.msra.mxu1 %v1104_v26  ;;  %v1180_v14 = vpack.c.bf16 %v673_v13, %v672_v12  ;;  %v1184_v17 = vpack.c.bf16 %v675_v16, %v674_v15  ;;  %v677_v18 = vld [vmem:[#allocation7 + $0x168] sm:$0xff]  ;;  %v678_v20 = vld [vmem:[#allocation7 + $0x170] sm:$0xff]  ;;  %v679_v21 = vld [vmem:[#allocation7 + $0x178] sm:$0xff] }
  0x7f   : > { %1109 = vmatprep.subr.bf16.mxu1 %v1108_v32  ;;  %v1192_v22 = vpack.c.bf16 %v679_v21, %v678_v20 }
  0x80   : > { %1139 = vmatpush3.bf16.msra.mxu0 %v1136_v29 }
  0x81   : > { %1141 = vmatprep.subr.bf16.mxu0 %v1140_v35 }
  0x82   : > { %1111 = vmatpush3.bf16.msra.mxu1 %v1108_v32 }
  0x83   : > { %1113 = vmatprep.subr.bf16.mxu1 %v1112_v38 }
  0x84   : > { %1143 = vmatpush3.bf16.msra.mxu0 %v1140_v35 }
  0x85   : > { %1145 = vmatprep.subr.bf16.mxu0 %v1144_v41 }
  0x86   : > { %1115 = vmatpush3.bf16.msra.mxu1 %v1112_v38 }
  0x87   : > { %1117 = vmatprep.subr.bf16.mxu1 %v1116_v44 }
  0x88   : > { %1147 = vmatpush3.bf16.msra.mxu0 %v1144_v41 }
  0x89   : > { %1149 = vmatprep.subr.bf16.mxu0 %v1148_v47 }
  0x8a   : > { %1119 = vmatpush3.bf16.msra.mxu1 %v1116_v44 }
  0x8b   : > { %1121 = vmatprep.subr.bf16.mxu1 %v1120_v50 }
  0x8c   : > { %1151 = vmatpush3.bf16.msra.mxu0 %v1148_v47 }
  0x8d   : > { %1153 = vmatprep.subr.bf16.mxu0 %v1152_v51 }
  0x8e   : > { %1123 = vmatpush3.bf16.msra.mxu1 %v1120_v50 }
  0x8f   : > { %1165 = vmatprep.subr.bf16.mxu1 %v1164_v57 }
  0x90   : > { %1155 = vmatpush3.bf16.msra.mxu0 %v1152_v51 }
  0x91   : > { %1157 = vmatprep.subr.bf16.mxu0 %v1156_v54 }
  0x94   : > { %1159 = vmatpush3.bf16.msra.mxu0 %v1156_v54 }
  0x95   : > { %1161 = vmatprep.subr.bf16.mxu0 %v1647_v3 }
 0x146   : > { %v968_v60 = vpop.f32.mrb[0].mxu0 }
 0x147   : > { %v294_v61 = vpop.f32.mrb[1].mxu0 }
 0x148   : > { %1001 = vmatprep.mubr.f32.mxu1 %v294_v61 }
 0x149   : > { %1002 = vmatmul.mubr.f32.vlgmr.msra.gmra.mrb[0].mxu1 %v968_v60 }
 0x14a   : > { %v1010_v4 = vpop.f32.mrb[2].mxu0  ;;  %1167 = vmatpush3.bf16.msra.mxu1 %v1164_v57 }
 0x14b   : > { %v473_v5 = vpop.f32.mrb[3].mxu0  ;;  %1169 = vmatprep.subr.bf16.mxu1 %v1168_v62 }
 0x14c   : > { %1043 = vmatprep.mubr.f32.mxu0 %v473_v5 }
 0x14d   : > { %1044 = vmatmul.mubr.f32.vlgmr.msra.gmra.mrb[4].mxu0 %v1010_v4 }
 0x14e   : > { %1163 = vmatpush3.bf16.msra.mxu0 %v1647_v3  ;;  %1050 = vmatprep.mubr.msk.f32.mxu0 %vm221_vm0, %v580_v6  ;;  %v676_v3 = vld [vmem:[#allocation7 + $0x160] sm:$0xff] }
 0x14f   : > { %1171 = vmatpush3.bf16.msra.mxu1 %v1168_v62  ;;  %v1188_v19 = vpack.c.bf16 %v677_v18, %v676_v3 }
 0x150   : > { %1173 = vmatprep.subr.bf16.mxu1 %v1172_v7 }
 0x151   : > { %1051 = vmatmul.mubr.msk.f32.vlgmr.msra.gmra.mrb[6].mxu0 %vm221_vm0, %v581_v10 }
 0x153   : > { %1175 = vmatpush3.bf16.msra.mxu1 %v1172_v7 }
 0x154   : > { %1177 = vmatprep.subr.bf16.mxu1 %v1176_v11 }
 0x157   : > { %1179 = vmatpush3.bf16.msra.mxu1 %v1176_v11 }
 0x158   : > { %1181 = vmatprep.subr.bf16.mxu1 %v1180_v14 }
 0x15b   : > { %1183 = vmatpush3.bf16.msra.mxu1 %v1180_v14 }
 0x15c   : > { %1185 = vmatprep.subr.bf16.mxu1 %v1184_v17 }
 0x15f   : > { %1187 = vmatpush3.bf16.msra.mxu1 %v1184_v17 }
 0x160   : > { %1189 = vmatprep.subr.bf16.mxu1 %v1188_v19 }
 0x163   : > { %1191 = vmatpush3.bf16.msra.mxu1 %v1188_v19 }
 0x164   : > { %1193 = vmatprep.subr.bf16.mxu1 %v1192_v22 }
 0x167   : > { %1195 = vmatpush3.bf16.msra.mxu1 %v1192_v22 }
 0x21c   : > { %v1003_v23 = vpop.f32.mrb[0].mxu1 }
 0x21d   : > { %v395_v24 = vsub.f32 %v1643_v1, %v1003_v23  ;;  %v385_v25 = vpop.f32.mrb[1].mxu1 }
 0x21e   : > { %v394_v26 = vsub.f32 %v1641_v0, %v385_v25 }
 0x21f   : > { %397 = vst [vmem:[%s216_s26 + $0x8] sm:$0xff] %v395_v24 }
 0x220   : > { %396 = vst [vmem:[%s216_s26] sm:$0xff] %v394_v26  ;;  %v1045_v27 = vpop.f32.mrb[4].mxu0 }
 0x221   : > { %v575_v28 = vsub.f32 %v1003_v23, %v1045_v27  ;;  %v565_v29 = vpop.f32.mrb[5].mxu0 }
 0x222   : > { %v574_v30 = vsub.f32 %v385_v25, %v565_v29 }
 0x223   : > { %885 = vst [vmem:[%s216_s26 + $0x18] sm:$0xff] %v575_v28 }
 0x224   : > { %884 = vst [vmem:[%s216_s26 + $0x10] sm:$0xff] %v574_v30  ;;  %v1052_v31 = vpop.f32.mrb[6].mxu0 }
 0x225   : > { %v654_v32 = vpop.f32.mrb[7].mxu0 }
 0x226   : > { %1085 = vmatprep.mubr.f32.mxu1 %v654_v32 }
 0x227   : > { %1086 = vmatmul.mubr.f32.vlgmr.msra.gmra.mrb[2].mxu1 %v1052_v31 }
 0x2fa   : > { %v1087_v0 = vpop.f32.mrb[2].mxu1 }
 0x2fb   : > { %v756_v1 = vsub.f32 %v1045_v27, %v1087_v0  ;;  %891 = vst [vmem:[%s216_s26 + $0x38] sm:$0xff] %v1087_v0  ;;  %v746_v33 = vpop.f32.mrb[3].mxu1 }
 0x2fc   : > { %v755_v34 = vsub.f32 %v565_v29, %v746_v33  ;;  %890 = vst [vmem:[%s216_s26 + $0x30] sm:$0xff] %v746_v33 }
 0x2fd   : > { %889 = vst [vmem:[%s216_s26 + $0x28] sm:$0xff] %v756_v1 }
 0x2fe   : > { %888 = vst [vmem:[%s216_s26 + $0x20] sm:$0xff] %v755_v34 }
 0x2ff   : > { %1368 = shalt.err (!%p1365_p5)
}
 0x300   : > { %s1369_s9 = scalar_lea.hbm %s1670_s28, 1024  ;;  %s1373_s17 = scalar_lea.hbm %s1717_s3, 2048 }
 0x301   : > { %p1370_p11 = scmp.ne.s32.totalorder %s1670_s28, %s1369_s9  ;;  %p1374_p6 = scmp.lt.u32.totalorder %s1670_s28, %s1717_s3 }
 0x302   : > { %p1375_p13 = scmp.lt.u32.totalorder %s1373_s17, %s1369_s9  ;;  %p1377_p7 = scmp.lt.u32.totalorder %s1369_s9, %s1670_s28 }
 0x303   : > { %p1371_p12 = pnand %p1370_p11, %p1737_p9 }
 0x304   : > { %p1376_p8 = por %p1375_p13, %p1374_p6 }
 0x305   : > { %p1372_p3 = pneg %p1371_p12 }
 0x306   : > { %p1378_p10 = por %p1377_p7, %p1376_p8 }
 0x308   : > { %p1379_p1 = pnand %p1378_p10, %p1372_p3 }
 0x30a   : > { %1382 = shalt.err (!%p1379_p1)
}
 0x30b   : > { %s1434_s23 = smov 128   ;;  %s1435_s26 = smov 256  }
 0x30c   : > { %s1436_s20 = smov 8  }
 0x30d   : > { %1206 = dma.vmem_to_hbm [thread:$0]  (%p1737_p9), %s1665_s19, 1024, %s1670_s28, %s764_s22, %s1434_s23, %s1435_s26, %s1436_s20  }
 0x30e PF: > { %s791_s5 = sand.u32 1, %s1413_s12   ;;  %p1738_p4 = scmp.ne.s32.totalorder %s1726_s25, 0 }
 0x30f   : > { %p1739_p0 = scmp.ge.s32.totalorder %s1425_s15, 2  ;;  %s792_s10 = scalar_lea.sflag [#allocation4], %s791_s5 }
 0x311   : > { %p1220_p2 = pnand %p1739_p0, %p1738_p4 }
 0x313   : > { %1408 = dma.done.wait (!%p1220_p2), %s792_s10, 1024  }
 0x314   : > { %1410 = vsyncadd (!%p1220_p2), %s792_s10, 4294966272  ;;  %p17_p5 = scmp.ge.s32.totalorder %s1482_s18, 4   ;;  %s1740_s12 = smov %s1417_s13 }
 0x315   : > { %s1741_s13 = smov %s1421_s14  ;;  %s1742_s14 = smov %s1494_s21 }
 0x316   : > { %s1743_s15 = smov %s1482_s18  ;;  %19 = sbr.rel (!%p17_p5) target bundleno = 6 (0x6), region = 92 }
 0x31d   :  { %797 = vsyncpa [#allocation3], 1 }
 0x31e   :  { %799 = vsyncpa [#allocation3 + $0x1], 1 }
 0x31f   :  { %800 = vsyncpa [#allocation6], 1 }
 0x320   :  { %801 = vsyncpa [#allocation4], 1 }
 0x321   :  { %803 = vsyncpa [#allocation4 + $0x1], 1 }

// kernel: tpu_custom_call.1
= control target key start
LH: loop header
LB: loop body
LE: loop exit
PB: predicated region body
PF: predicated region fallthrough
CT: control target
= control target key end

     0   :  { %8 = vsyncpa [#allocation3], 0  ;;  %s1714_s0 = inlined_call_operand.hbm [shape: f32[16,256], index: 0, kind: input, shape index: {}]   ;;  %s1715_s1 = inlined_call_operand.hbm [shape: f32[3,16,16], index: 1, kind: input, shape index: {}]   ;;  %s1716_s2 = inlined_call_operand.hbm [shape: f32[3,128,128], index: 2, kind: input, shape index: {}]   ;;  %s1717_s3 = inlined_call_operand.hbm [shape: f32[4,16,256], index: 3, kind: output, shape index: {}]  }
   0x1   :  { %10 = vsyncpa [#allocation3 + $0x1], 0 }
   0x2   :  { %11 = vsyncpa [#allocation6], 0 }
   0x3   :  { %12 = vsyncpa [#allocation4], 0 }
   0x4   :  { %14 = vsyncpa [#allocation4 + $0x1], 0  ;;  %s1457_s12 = smov 0   ;;  %s1459_s13 = smov 0  }
   0x5   :  { %s1461_s14 = smov 0   ;;  %s1463_s15 = smov 0  }
   0x6 LB: > { %s1478_s16 = sadd.s32 4294967295, %s1425_s15   ;;  %s868_s17 = sadd.s32 4294967294, %s1425_s15   ;;  %s1425_s15 = sphi %s1463_s15, %s1743_s15   ;;  %s1421_s14 = sphi %s1461_s14, %s1742_s14   ;;  %s1417_s13 = sphi %s1459_s13, %s1741_s13   ;;  %s1413_s12 = sphi %s1457_s12, %s1740_s12  }
   0x7   : > { %s1482_s18 = sadd.s32 1, %s1425_s15   ;;  %s27_s19 = sadd.s32 1, %s1421_s14 }
   0x8   : > { %s24_s20 = ssub.s32 %s1425_s15, %s1482_s18  ;;  %p34_p0 = scmp.ne.s32.totalorder %s1421_s14, %s1417_s13 }
   0x9   : > { %p25_p1 = scmp.eq.s32.totalorder %s24_s20, 0  ;;  %p35_p2 = scmp.eq.s32.totalorder %s1425_s15, 0 }
   0xa   : > { %p40_p3 = scmp.ne.s32.totalorder %s1417_s13, %s1413_s12  ;;  %p1718_p4 = scmp.eq.s32.totalorder %s1478_s16, 0 }
   0xb   : > { %s1494_s21 = scalar_select %p25_p1, %s1421_s14, %s27_s19  }
   0xc   : > { %p1496_p5 = por %p35_p2, %p34_p0  ;;  %p1502_p6 = por %p1718_p4, %p40_p3 }
   0xd   : > { %p106_p7 = scmp.eq.s32.totalorder %s1478_s16, 1  ;;  %p112_p8 = scmp.eq.s32.totalorder %s868_s17, 1 }
   0xe   : > { %s1723_s22 = scalar_select %p1496_p5, 1, 0 }
   0xf   : > { %s1724_s23 = scalar_select %p1502_p6, 1, 0 }
  0x10   : > { %p869_p9 = scmp.ge.s32.totalorder %s1425_s15, 1  ;;  %p119_p10 = scmp.lt.s32.totalorder %s1425_s15, 3 }
  0x11   : > { %p1509_p11 = por %p106_p7, %p34_p0  ;;  %p1513_p12 = por %p112_p8, %p40_p3 }
  0x12   : > { %p1517_p13 = pnand %p869_p9, %p119_p10  ;;  %s1427_s27 = smov [#allocation5]  }
  0x13   : > { %s1725_s24 = scalar_select %p1509_p11, 1, 0 }
  0x14   : > { %s1726_s25 = scalar_select %p1513_p12, 1, 0 }
  0x15   : > { %s1727_s26 = scalar_select %p1517_p13, 1, 0 }
  0x16   : > { %p1208_p1 = pneg %p1517_p13  ;;  %s131_s28 = sshll.u32 %s1427_s27, 4  ;;  %s132_s28 = int_to_ptr.vmem [resolvable:$true] %s131_s28 }
  0x17   : > { %s1428_s30 = smov [#allocation7]   ;;  %s1269_s7 = scalar_lea.hbm %s1715_s1, 768 }
  0x18   : > { %p1525_p2 = pnand %p1208_p1, %p1718_p4  ;;  %s144_s4 = sshll.u32 %s1428_s30, 4  ;;  %s145_s4 = int_to_ptr.vmem [resolvable:$true] %s144_s4 }
  0x19   : > { %p1270_p7 = scmp.ne.s32.totalorder %s1715_s1, %s1269_s7  ;;  %p1276_p1 = scmp.lt.u32.totalorder %s1269_s7, %s1715_s1 }
  0x1a   : > { %p1271_p8 = pneg %p1525_p2 }
  0x1c   : > { %p1272_p9 = pnand %p1271_p8, %p1270_p7 }
  0x1e   : > { %p1273_p10 = pneg %p1272_p9 }
  0x20   : > { %p1278_p0 = pnand %p1276_p1, %p1273_p10 }
  0x22   : > { %1281 = shalt.err (!%p1278_p0)
}
  0x23   : > { %s1282_s17 = scalar_lea.vmem %s132_s28, 768  ;;  %p1290_p11 = scmp.lt.s32.totalorder %s132_s28, %s132_s28 }
  0x24   : > { %p1283_p4 = scmp.ne.s32.totalorder %s132_s28, %s1282_s17  ;;  %p1291_p6 = scmp.lt.s32.totalorder %s1282_s17, %s1282_s17 }
  0x26   : > { %p1285_p3 = pnand %p1283_p4, %p1271_p8  ;;  %p1292_p13 = por %p1291_p6, %p1290_p11 }
  0x28   : > { %p1286_p12 = pneg %p1285_p3 }
  0x2a   : > { %p1293_p5 = pnand %p1292_p13, %p1286_p12 }
  0x2c   : > { %1296 = shalt.err (!%p1293_p5)
}
  0x2d   : > { %s1429_s19 = smov 128   ;;  %s1430_s20 = smov 8  }
  0x2e   : > { %1211 = dma.hbm_to_vmem [thread:$0]  (!%p1525_p2), %s1715_s1, 768, %s132_s28, [#allocation6], %s1429_s19, %s1429_s19, %s1430_s20  }
  0x2f   : > { %p1729_p4 = scmp.ne.s32.totalorder %s1723_s22, 0  ;;  %p1730_p0 = scmp.lt.s32.totalorder %s1425_s15, 2 }
  0x30   : > { %s1297_s8 = scalar_lea.hbm %s1716_s2, 6144 }
  0x31   : > { %p1560_p3 = pnand %p1730_p0, %p1729_p4  ;;  %p1298_p5 = scmp.ne.s32.totalorder %s1716_s2, %s1297_s8 }
  0x32   : > { %p1304_p12 = scmp.lt.u32.totalorder %s1297_s8, %s1716_s2 }
  0x33   : > { %s1731_s5 = scalar_select %p1560_p3, 1, 0 }
  0x34   : > { %p1300_p6 = pnand %p1298_p5, %p1271_p8 }
  0x36   : > { %p1301_p11 = pneg %p1300_p6 }
  0x38   : > { %p1306_p13 = pnand %p1304_p12, %p1301_p11 }
  0x3a   : > { %1309 = shalt.err (!%p1306_p13)
}
  0x3b   : > { %s1310_s11 = scalar_lea.vmem %s145_s4, 6144  ;;  %p1318_p1 = scmp.lt.s32.totalorder %s145_s4, %s145_s4 }
  0x3c   : > { %p1311_p7 = scmp.ne.s32.totalorder %s145_s4, %s1310_s11  ;;  %p1319_p4 = scmp.lt.s32.totalorder %s1310_s11, %s1310_s11 }
  0x3e   : > { %p1313_p9 = pnand %p1311_p7, %p1271_p8  ;;  %p1320_p0 = por %p1319_p4, %p1318_p1 }
  0x40   : > { %p1314_p10 = pneg %p1313_p9 }
  0x42   : > { %p1321_p3 = pnand %p1320_p0, %p1314_p10 }
  0x44   : > { %1324 = shalt.err (!%p1321_p3)
}
  0x45   : > { %1214 = dma.hbm_to_vmem [thread:$0]  (!%p1525_p2), %s1716_s2, 6144, %s145_s4, [#allocation6], %s1429_s19, %s1429_s19, %s1430_s20  }
  0x46   : > { %s158_s30 = sand.u32 1, %s1421_s14   ;;  %s874_s7 = sshll.u32 %s1425_s15, 7 }
  0x47   : > { %s873_s6 = sshll.u32 %s158_s30, 4  ;;  %s1592_s10 = scalar_lea.hbm %s1714_s0, %s874_s7 }
  0x48   : > { %s162_s29 = scalar_lea.vmem [#allocation2], %s873_s6  ;;  %s1596_s22 = scalar_lea.sflag [#allocation3], %s158_s30 }
  0x49   : > { %s168_s28 = sshll.u32 %s162_s29, 4  ;;  %s1325_s11 = scalar_lea.hbm %s1592_s10, 256  ;;  %s1594_s28 = int_to_ptr.vmem [resolvable:$true] %s168_s28 }
  0x4a   : > { %p1326_p2 = scmp.ne.s32.totalorder %s1592_s10, %s1325_s11  ;;  %p1732_p8 = scmp.ne.s32.totalorder %s1731_s5, 0 }
  0x4b   : > { %s1330_s27 = scalar_lea.hbm %s1714_s0, 512  ;;  %p1331_p11 = scmp.lt.u32.totalorder %s1592_s10, %s1714_s0 }
  0x4c   : > { %p1327_p3 = pneg %p1732_p8  ;;  %p1332_p12 = scmp.lt.u32.totalorder %s1330_s27, %s1325_s11 }
  0x4d   : > { %p1334_p7 = scmp.lt.u32.totalorder %s1325_s11, %s1592_s10 }
  0x4e   : > { %p1328_p5 = pnand %p1327_p3, %p1326_p2  ;;  %p1333_p13 = por %p1332_p12, %p1331_p11 }
  0x50   : > { %p1329_p6 = pneg %p1328_p5  ;;  %p1335_p9 = por %p1334_p7, %p1333_p13 }
  0x52   : > { %p1336_p10 = pnand %p1335_p9, %p1329_p6 }
  0x54   : > { %1339 = shalt.err (!%p1336_p10)
}
  0x55   : > { %s1340_s30 = scalar_lea.vmem %s1594_s28, 256  ;;  %s1431_s6 = smov [#allocation2]  }
  0x56   : > { %p1341_p1 = scmp.ne.s32.totalorder %s1594_s28, %s1340_s30  ;;  %s1345_s9 = sshll.u32 %s1431_s6, 4  ;;  %s1346_s9 = int_to_ptr.vmem [resolvable:$false] %s1345_s9 }
  0x57   : > { %s1347_s29 = scalar_lea.vmem %s1346_s9, 512  ;;  %p1348_p2 = scmp.lt.s32.totalorder %s1594_s28, %s1346_s9 }
  0x58   : > { %p1343_p4 = pnand %p1341_p1, %p1327_p3  ;;  %p1349_p5 = scmp.lt.s32.totalorder %s1347_s29, %s1340_s30 }
  0x5a   : > { %p1344_p0 = pneg %p1343_p4  ;;  %p1350_p11 = por %p1349_p5, %p1348_p2 }
  0x5c   : > { %p1351_p12 = pnand %p1350_p11, %p1344_p0 }
  0x5e   : > { %1354 = shalt.err (!%p1351_p12)
}
  0x5f   : > { %s1432_s11 = smov 256   ;;  %p1733_p3 = scmp.ne.s32.totalorder %s1727_s26, 0 }
  0x60   : > { %1218 = dma.hbm_to_vmem [thread:$0]  (!%p1732_p8), %s1592_s10, 256, %s1594_s28, %s1596_s22, %s1432_s11, %s1429_s19, %s1430_s20  }
  0x61   : > { %180 = sbr.rel (%p1733_p3) target bundleno = 782 (0x30e), region = 32  ;;  %s1629_s4 = sand.u32 (!%p1733_p3), 1, %s1417_s13  }
  0x62   : > { %s876_s17 = sshll.u32 (!%p1733_p3), %s1629_s4, 4  ;;  %s183_s27 = scalar_lea.sflag (!%p1733_p3), [#allocation3], %s1629_s4 }
  0x63   : > { %s186_s7 = scalar_lea.vmem (!%p1733_p3), [#allocation2], %s876_s17  ;;  %p1734_p6 = scmp.ne.s32.totalorder (!%p1733_p3), %s1724_s23, 0 }
  0x68   : > { %1400 = dma.done.wait (%p1734_p6), %s183_s27, 256  }
  0x69   : > { %1402 = vsyncadd (%p1734_p6), %s183_s27, 4294967040  ;;  %p1735_p13 = scmp.eq.s32.totalorder %s1478_s16, 0 }
  0x6b   : > { %1404 = dma.done.wait (%p1735_p13), [#allocation6], 6912   ;;  %p1736_p8 = pmov %p1735_p13 }
  0x6c   : > { %vm221_vm0 = vcmask 130048   ;;  %v1641_v0 = vld [vmem:[%s186_s7] sm:$0xff]  ;;  %v1643_v1 = vld [vmem:[%s186_s7 + $0x8] sm:$0xff]  ;;  %s879_s23 = sshll.u32 %s1629_s4, 6  ;;  %s893_s20 = sshll.u32 %s1478_s16, 7 }
  0x6d   : > { %1406 = vsyncadd (%p1736_p8), [#allocation6], 4294960384  ;;  %v219_v2 = vld [vmem:[#allocation5] sm:$0xff]  ;;  %v1647_v3 = vpack.c.bf16 %v1643_v1, %v1641_v0  ;;  %v303_v4 = vld [vmem:[#allocation7] sm:$0xff]  ;;  %s216_s26 = scalar_lea.vmem [#allocation8], %s879_s23  ;;  %s1670_s28 = scalar_lea.hbm %s1717_s3, %s893_s20 }
  0x6e   : > { %966 = vmatprep.mubr.msk.f32.mxu0 %vm221_vm0, %v219_v2  ;;  %v304_v5 = vld [vmem:[#allocation7 + $0x8] sm:$0xff]  ;;  %v305_v6 = vld [vmem:[#allocation7 + $0x10] sm:$0xff]  ;;  %v306_v8 = vld [vmem:[#allocation7 + $0x18] sm:$0xff]  ;;  %s776_s19 = sshll.u32 %s216_s26, 4  ;;  %s764_s22 = scalar_lea.sflag [#allocation4], %s1629_s4  ;;  %s1665_s19 = int_to_ptr.vmem [resolvable:$true] %s776_s19 }
  0x6f   : > { %1089 = vmatprep.subr.bf16.mxu0 %v1647_v3  ;;  %v1092_v7 = vpack.c.bf16 %v304_v5, %v303_v4  ;;  %v483_v9 = vld [vmem:[#allocation7 + $0x80] sm:$0xff]  ;;  %v484_v10 = vld [vmem:[#allocation7 + $0x88] sm:$0xff]  ;;  %v220_v11 = vld [vmem:[#allocation5 + $0x8] sm:$0xff]  ;;  %v1096_v12 = vpack.c.bf16 %v306_v8, %v305_v6  ;;  %s1355_s16 = scalar_lea.vmem %s1665_s19, 1024  ;;  %p1737_p9 = scmp.ne.s32.totalorder %s1725_s24, 0 }
  0x70   : > { %1091 = vmatpush3.bf16.msra.mxu0 %v1647_v3  ;;  %v307_v13 = vld [vmem:[#allocation7 + $0x20] sm:$0xff]  ;;  %v308_v14 = vld [vmem:[#allocation7 + $0x28] sm:$0xff]  ;;  %v1128_v16 = vpack.c.bf16 %v484_v10, %v483_v9  ;;  %v485_v17 = vld [vmem:[#allocation7 + $0x90] sm:$0xff]  ;;  %p1356_p7 = scmp.ne.s32.totalorder %s1665_s19, %s1355_s16  ;;  %s1433_s8 = smov [#allocation8]  }
  0x71   : > { %1125 = vmatprep.subr.bf16.mxu0 %v1647_v3  ;;  %v399_v15 = vld [vmem:[#allocation5 + $0x10] sm:$0xff]  ;;  %1093 = vmatprep.subr.bf16.mxu1 %v1092_v7  ;;  %v486_v18 = vld [vmem:[#allocation7 + $0x98] sm:$0xff]  ;;  %v1100_v19 = vpack.c.bf16 %v308_v14, %v307_v13  ;;  %v400_v20 = vld [vmem:[#allocation5 + $0x18] sm:$0xff]  ;;  %s1359_s30 = sshll.u32 %s1433_s8, 4  ;;  %s1360_s30 = int_to_ptr.vmem [resolvable:$false] %s1359_s30 }
  0x72   : > { %1095 = vmatpush3.bf16.msra.mxu1 %v1092_v7  ;;  %v309_v21 = vld [vmem:[#allocation7 + $0x30] sm:$0xff]  ;;  %v310_v22 = vld [vmem:[#allocation7 + $0x38] sm:$0xff]  ;;  %v1132_v23 = vpack.c.bf16 %v486_v18, %v485_v17  ;;  %v487_v24 = vld [vmem:[#allocation7 + $0xa0] sm:$0xff]  ;;  %p1357_p10 = pnand %p1356_p7, %p1737_p9  ;;  %s1361_s6 = scalar_lea.vmem %s1360_s30, 2048 }
  0x73   : > { %967 = vmatmul.mubr.msk.f32.vlgmr.msra.gmra.mrb[0].mxu0 %vm221_vm0, %v220_v11  ;;  %1097 = vmatprep.subr.bf16.mxu1 %v1096_v12  ;;  %v488_v25 = vld [vmem:[#allocation7 + $0xa8] sm:$0xff]  ;;  %v1104_v26 = vpack.c.bf16 %v310_v22, %v309_v21  ;;  %v311_v27 = vld [vmem:[#allocation7 + $0x40] sm:$0xff]  ;;  %v489_v30 = vld [vmem:[#allocation7 + $0xb0] sm:$0xff]  ;;  %p1362_p4 = scmp.lt.s32.totalorder %s1665_s19, %s1360_s30  ;;  %p1363_p0 = scmp.lt.s32.totalorder %s1361_s6, %s1355_s16 }
  0x74   : > { %1127 = vmatpush3.bf16.msra.mxu0 %v1647_v3  ;;  %1008 = vmatprep.mubr.msk.f32.mxu0 %vm221_vm0, %v399_v15  ;;  %v312_v28 = vld [vmem:[#allocation7 + $0x48] sm:$0xff]  ;;  %v1136_v29 = vpack.c.bf16 %v488_v25, %v487_v24  ;;  %v490_v31 = vld [vmem:[#allocation7 + $0xb8] sm:$0xff]  ;;  %v313_v33 = vld [vmem:[#allocation7 + $0x50] sm:$0xff]  ;;  %p1358_p1 = pneg %p1357_p10 }
  0x75   : > { %1129 = vmatprep.subr.bf16.mxu0 %v1128_v16  ;;  %v1108_v32 = vpack.c.bf16 %v312_v28, %v311_v27  ;;  %v314_v34 = vld [vmem:[#allocation7 + $0x58] sm:$0xff]  ;;  %v1140_v35 = vpack.c.bf16 %v490_v31, %v489_v30  ;;  %v491_v36 = vld [vmem:[#allocation7 + $0xc0] sm:$0xff]  ;;  %v492_v37 = vld [vmem:[#allocation7 + $0xc8] sm:$0xff]  ;;  %p1364_p2 = por %p1363_p0, %p1362_p4 }
  0x76   : > { %1099 = vmatpush3.bf16.msra.mxu1 %v1096_v12  ;;  %v1112_v38 = vpack.c.bf16 %v314_v34, %v313_v33  ;;  %v315_v39 = vld [vmem:[#allocation7 + $0x60] sm:$0xff]  ;;  %v316_v40 = vld [vmem:[#allocation7 + $0x68] sm:$0xff]  ;;  %v1144_v41 = vpack.c.bf16 %v492_v37, %v491_v36  ;;  %v493_v42 = vld [vmem:[#allocation7 + $0xd0] sm:$0xff] }
  0x77   : > { %1009 = vmatmul.mubr.msk.f32.vlgmr.msra.gmra.mrb[2].mxu0 %vm221_vm0, %v400_v20  ;;  %1101 = vmatprep.subr.bf16.mxu1 %v1100_v19  ;;  %v494_v43 = vld [vmem:[#allocation7 + $0xd8] sm:$0xff]  ;;  %v1116_v44 = vpack.c.bf16 %v316_v40, %v315_v39  ;;  %v317_v45 = vld [vmem:[#allocation7 + $0x70] sm:$0xff]  ;;  %v495_v48 = vld [vmem:[#allocation7 + $0xe0] sm:$0xff]  ;;  %p1365_p5 = pnand %p1364_p2, %p1358_p1 }
  0x78   : > { %1131 = vmatpush3.bf16.msra.mxu0 %v1128_v16  ;;  %v318_v46 = vld [vmem:[#allocation7 + $0x78] sm:$0xff]  ;;  %v1148_v47 = vpack.c.bf16 %v494_v43, %v493_v42  ;;  %v496_v49 = vld [vmem:[#allocation7 + $0xe8] sm:$0xff]  ;;  %v497_v52 = vld [vmem:[#allocation7 + $0xf0] sm:$0xff] }
  0x79   : > { %1133 = vmatprep.subr.bf16.mxu0 %v1132_v23  ;;  %v1120_v50 = vpack.c.bf16 %v318_v46, %v317_v45  ;;  %v1152_v51 = vpack.c.bf16 %v496_v49, %v495_v48  ;;  %v498_v53 = vld [vmem:[#allocation7 + $0xf8] sm:$0xff]  ;;  %v664_v55 = vld [vmem:[#allocation7 + $0x100] sm:$0xff]  ;;  %v665_v56 = vld [vmem:[#allocation7 + $0x108] sm:$0xff] }
  0x7a   : > { %1103 = vmatpush3.bf16.msra.mxu1 %v1100_v19  ;;  %v1156_v54 = vpack.c.bf16 %v498_v53, %v497_v52  ;;  %v1164_v57 = vpack.c.bf16 %v665_v56, %v664_v55  ;;  %v666_v58 = vld [vmem:[#allocation7 + $0x110] sm:$0xff]  ;;  %v667_v59 = vld [vmem:[#allocation7 + $0x118] sm:$0xff]  ;;  %v668_v63 = vld [vmem:[#allocation7 + $0x120] sm:$0xff] }
  0x7b   : > { %1105 = vmatprep.subr.bf16.mxu1 %v1104_v26  ;;  %v1168_v62 = vpack.c.bf16 %v667_v59, %v666_v58  ;;  %v669_v2 = vld [vmem:[#allocation7 + $0x128] sm:$0xff]  ;;  %v580_v6 = vld [vmem:[#allocation5 + $0x20] sm:$0xff]  ;;  %v671_v9 = vld [vmem:[#allocation7 + $0x138] sm:$0xff] }
  0x7c   : > { %1135 = vmatpush3.bf16.msra.mxu0 %v1132_v23  ;;  %v1172_v7 = vpack.c.bf16 %v669_v2, %v668_v63  ;;  %v670_v8 = vld [vmem:[#allocation7 + $0x130] sm:$0xff]  ;;  %v581_v10 = vld [vmem:[#allocation5 + $0x28] sm:$0xff]  ;;  %v672_v12 = vld [vmem:[#allocation7 + $0x140] sm:$0xff] }
  0x7d   : > { %1137 = vmatprep.subr.bf16.mxu0 %v1136_v29  ;;  %v1176_v11 = vpack.c.bf16 %v671_v9, %v670_v8  ;;  %v673_v13 = vld [vmem:[#allocation7 + $0x148] sm:$0xff]  ;;  %v674_v15 = vld [vmem:[#allocation7 + $0x150] sm:$0xff]  ;;  %v675_v16 = vld [vmem:[#allocation7 + $0x158] sm:$0xff] }
  0x7e   : > { %1107 = vmatpush3.bf16.msra.mxu1 %v1104_v26  ;;  %v1180_v14 = vpack.c.bf16 %v673_v13, %v672_v12  ;;  %v1184_v17 = vpack.c.bf16 %v675_v16, %v674_v15  ;;  %v677_v18 = vld [vmem:[#allocation7 + $0x168] sm:$0xff]  ;;  %v678_v20 = vld [vmem:[#allocation7 + $0x170] sm:$0xff]  ;;  %v679_v21 = vld [vmem:[#allocation7 + $0x178] sm:$0xff] }
  0x7f   : > { %1109 = vmatprep.subr.bf16.mxu1 %v1108_v32  ;;  %v1192_v22 = vpack.c.bf16 %v679_v21, %v678_v20 }
  0x80   : > { %1139 = vmatpush3.bf16.msra.mxu0 %v1136_v29 }
  0x81   : > { %1141 = vmatprep.subr.bf16.mxu0 %v1140_v35 }
  0x82   : > { %1111 = vmatpush3.bf16.msra.mxu1 %v1108_v32 }
  0x83   : > { %1113 = vmatprep.subr.bf16.mxu1 %v1112_v38 }
  0x84   : > { %1143 = vmatpush3.bf16.msra.mxu0 %v1140_v35 }
  0x85   : > { %1145 = vmatprep.subr.bf16.mxu0 %v1144_v41 }
  0x86   : > { %1115 = vmatpush3.bf16.msra.mxu1 %v1112_v38 }
  0x87   : > { %1117 = vmatprep.subr.bf16.mxu1 %v1116_v44 }
  0x88   : > { %1147 = vmatpush3.bf16.msra.mxu0 %v1144_v41 }
  0x89   : > { %1149 = vmatprep.subr.bf16.mxu0 %v1148_v47 }
  0x8a   : > { %1119 = vmatpush3.bf16.msra.mxu1 %v1116_v44 }
  0x8b   : > { %1121 = vmatprep.subr.bf16.mxu1 %v1120_v50 }
  0x8c   : > { %1151 = vmatpush3.bf16.msra.mxu0 %v1148_v47 }
  0x8d   : > { %1153 = vmatprep.subr.bf16.mxu0 %v1152_v51 }
  0x8e   : > { %1123 = vmatpush3.bf16.msra.mxu1 %v1120_v50 }
  0x8f   : > { %1165 = vmatprep.subr.bf16.mxu1 %v1164_v57 }
  0x90   : > { %1155 = vmatpush3.bf16.msra.mxu0 %v1152_v51 }
  0x91   : > { %1157 = vmatprep.subr.bf16.mxu0 %v1156_v54 }
  0x94   : > { %1159 = vmatpush3.bf16.msra.mxu0 %v1156_v54 }
  0x95   : > { %1161 = vmatprep.subr.bf16.mxu0 %v1647_v3 }
 0x146   : > { %v968_v60 = vpop.f32.mrb[0].mxu0 }
 0x147   : > { %v294_v61 = vpop.f32.mrb[1].mxu0 }
 0x148   : > { %1001 = vmatprep.mubr.f32.mxu1 %v294_v61 }
 0x149   : > { %1002 = vmatmul.mubr.f32.vlgmr.msra.gmra.mrb[0].mxu1 %v968_v60 }
 0x14a   : > { %v1010_v4 = vpop.f32.mrb[2].mxu0  ;;  %1167 = vmatpush3.bf16.msra.mxu1 %v1164_v57 }
 0x14b   : > { %v473_v5 = vpop.f32.mrb[3].mxu0  ;;  %1169 = vmatprep.subr.bf16.mxu1 %v1168_v62 }
 0x14c   : > { %1043 = vmatprep.mubr.f32.mxu0 %v473_v5 }
 0x14d   : > { %1044 = vmatmul.mubr.f32.vlgmr.msra.gmra.mrb[4].mxu0 %v1010_v4 }
 0x14e   : > { %1163 = vmatpush3.bf16.msra.mxu0 %v1647_v3  ;;  %1050 = vmatprep.mubr.msk.f32.mxu0 %vm221_vm0, %v580_v6  ;;  %v676_v3 = vld [vmem:[#allocation7 + $0x160] sm:$0xff] }
 0x14f   : > { %1171 = vmatpush3.bf16.msra.mxu1 %v1168_v62  ;;  %v1188_v19 = vpack.c.bf16 %v677_v18, %v676_v3 }
 0x150   : > { %1173 = vmatprep.subr.bf16.mxu1 %v1172_v7 }
 0x151   : > { %1051 = vmatmul.mubr.msk.f32.vlgmr.msra.gmra.mrb[6].mxu0 %vm221_vm0, %v581_v10 }
 0x153   : > { %1175 = vmatpush3.bf16.msra.mxu1 %v1172_v7 }
 0x154   : > { %1177 = vmatprep.subr.bf16.mxu1 %v1176_v11 }
 0x157   : > { %1179 = vmatpush3.bf16.msra.mxu1 %v1176_v11 }
 0x158   : > { %1181 = vmatprep.subr.bf16.mxu1 %v1180_v14 }
 0x15b   : > { %1183 = vmatpush3.bf16.msra.mxu1 %v1180_v14 }
 0x15c   : > { %1185 = vmatprep.subr.bf16.mxu1 %v1184_v17 }
 0x15f   : > { %1187 = vmatpush3.bf16.msra.mxu1 %v1184_v17 }
 0x160   : > { %1189 = vmatprep.subr.bf16.mxu1 %v1188_v19 }
 0x163   : > { %1191 = vmatpush3.bf16.msra.mxu1 %v1188_v19 }
 0x164   : > { %1193 = vmatprep.subr.bf16.mxu1 %v1192_v22 }
 0x167   : > { %1195 = vmatpush3.bf16.msra.mxu1 %v1192_v22 }
 0x21c   : > { %v1003_v23 = vpop.f32.mrb[0].mxu1 }
 0x21d   : > { %v395_v24 = vsub.f32 %v1643_v1, %v1003_v23  ;;  %v385_v25 = vpop.f32.mrb[1].mxu1 }
 0x21e   : > { %v394_v26 = vsub.f32 %v1641_v0, %v385_v25 }
 0x21f   : > { %397 = vst [vmem:[%s216_s26 + $0x8] sm:$0xff] %v395_v24 }
 0x220   : > { %396 = vst [vmem:[%s216_s26] sm:$0xff] %v394_v26  ;;  %v1045_v27 = vpop.f32.mrb[4].mxu0 }
 0x221   : > { %v575_v28 = vsub.f32 %v1003_v23, %v1045_v27  ;;  %v565_v29 = vpop.f32.mrb[5].mxu0 }
 0x222   : > { %v574_v30 = vsub.f32 %v385_v25, %v565_v29 }
 0x223   : > { %885 = vst [vmem:[%s216_s26 + $0x18] sm:$0xff] %v575_v28 }
 0x224   : > { %884 = vst [vmem:[%s216_s26 + $0x10] sm:$0xff] %v574_v30  ;;  %v1052_v31 = vpop.f32.mrb[6].mxu0 }
 0x225   : > { %v654_v32 = vpop.f32.mrb[7].mxu0 }
 0x226   : > { %1085 = vmatprep.mubr.f32.mxu1 %v654_v32 }
 0x227   : > { %1086 = vmatmul.mubr.f32.vlgmr.msra.gmra.mrb[2].mxu1 %v1052_v31 }
 0x2fa   : > { %v1087_v0 = vpop.f32.mrb[2].mxu1 }
 0x2fb   : > { %v756_v1 = vsub.f32 %v1045_v27, %v1087_v0  ;;  %891 = vst [vmem:[%s216_s26 + $0x38] sm:$0xff] %v1087_v0  ;;  %v746_v33 = vpop.f32.mrb[3].mxu1 }
 0x2fc   : > { %v755_v34 = vsub.f32 %v565_v29, %v746_v33  ;;  %890 = vst [vmem:[%s216_s26 + $0x30] sm:$0xff] %v746_v33 }
 0x2fd   : > { %889 = vst [vmem:[%s216_s26 + $0x28] sm:$0xff] %v756_v1 }
 0x2fe   : > { %888 = vst [vmem:[%s216_s26 + $0x20] sm:$0xff] %v755_v34 }
 0x2ff   : > { %1368 = shalt.err (!%p1365_p5)
}
 0x300   : > { %s1369_s9 = scalar_lea.hbm %s1670_s28, 1024  ;;  %s1373_s17 = scalar_lea.hbm %s1717_s3, 2048 }
 0x301   : > { %p1370_p11 = scmp.ne.s32.totalorder %s1670_s28, %s1369_s9  ;;  %p1374_p6 = scmp.lt.u32.totalorder %s1670_s28, %s1717_s3 }
 0x302   : > { %p1375_p13 = scmp.lt.u32.totalorder %s1373_s17, %s1369_s9  ;;  %p1377_p7 = scmp.lt.u32.totalorder %s1369_s9, %s1670_s28 }
 0x303   : > { %p1371_p12 = pnand %p1370_p11, %p1737_p9 }
 0x304   : > { %p1376_p8 = por %p1375_p13, %p1374_p6 }
 0x305   : > { %p1372_p3 = pneg %p1371_p12 }
 0x306   : > { %p1378_p10 = por %p1377_p7, %p1376_p8 }
 0x308   : > { %p1379_p1 = pnand %p1378_p10, %p1372_p3 }
 0x30a   : > { %1382 = shalt.err (!%p1379_p1)
}
 0x30b   : > { %s1434_s23 = smov 128   ;;  %s1435_s26 = smov 256  }
 0x30c   : > { %s1436_s20 = smov 8  }
 0x30d   : > { %1206 = dma.vmem_to_hbm [thread:$0]  (%p1737_p9), %s1665_s19, 1024, %s1670_s28, %s764_s22, %s1434_s23, %s1435_s26, %s1436_s20  }
 0x30e PF: > { %s791_s5 = sand.u32 1, %s1413_s12   ;;  %p1738_p4 = scmp.ne.s32.totalorder %s1726_s25, 0 }
 0x30f   : > { %p1739_p0 = scmp.ge.s32.totalorder %s1425_s15, 2  ;;  %s792_s10 = scalar_lea.sflag [#allocation4], %s791_s5 }
 0x311   : > { %p1220_p2 = pnand %p1739_p0, %p1738_p4 }
 0x313   : > { %1408 = dma.done.wait (!%p1220_p2), %s792_s10, 1024  }
 0x314   : > { %1410 = vsyncadd (!%p1220_p2), %s792_s10, 4294966272  ;;  %p17_p5 = scmp.ge.s32.totalorder %s1482_s18, 4   ;;  %s1740_s12 = smov %s1417_s13 }
 0x315   : > { %s1741_s13 = smov %s1421_s14  ;;  %s1742_s14 = smov %s1494_s21 }
 0x316   : > { %s1743_s15 = smov %s1482_s18  ;;  %19 = sbr.rel (!%p17_p5) target bundleno = 6 (0x6), region = 92 }
 0x31d   :  { %797 = vsyncpa [#allocation3], 1 }
 0x31e   :  { %799 = vsyncpa [#allocation3 + $0x1], 1 }
 0x31f   :  { %800 = vsyncpa [#allocation6], 1 }
 0x320   :  { %801 = vsyncpa [#allocation4], 1 }
 0x321   :  { %803 = vsyncpa [#allocation4 + $0x1], 1 }

</bundles_post_ra>
